<compile_context>
chip_gen: v7x
topology: tpu7x:2x2x1
jax: 0.10.0
libtpu: 0.0.40
codegen_flags: <defaults>
</compile_context>

<pallas_src>
import jax
import jax.numpy as jnp
from jax import lax
from jax.experimental import pallas as pl
from jax.experimental.pallas import tpu as pltpu


def _round_up(x, m):
    return ((x + m - 1) // m) * m


def _leaky_relu(x, slope=0.2):
    return jnp.where(x >= 0, x, slope * x)


def _mi_disc_kernel(r_ref, y_ref, w1r_ref, w1y_ref, b1_ref, w2_ref, b2_ref,
                    w3c_ref, b3_ref, out_ref):
    # r_ref: [TB, u_dim], y_ref: [TB, y_dim]  (native batch-major tiles).
    # All intermediates keep batch in the lane dim: [H, TB].
    contract_feat = (((1,), (1,)), ((), ()))   # contract axis 1 of both operands

    # Layer 1: W1 @ concat(r, y)^T realized as two feature-axis contractions
    # (no concat / transpose materialized).            -> [H1, TB]
    h1 = (lax.dot_general(w1r_ref[...], r_ref[...], contract_feat,
                          preferred_element_type=jnp.float32)
          + lax.dot_general(w1y_ref[...], y_ref[...], contract_feat,
                            preferred_element_type=jnp.float32)
          + b1_ref[...])
    h1 = _leaky_relu(h1)

    # Layer 2: [H2, H1] @ [H1, TB]                     -> [H2, TB]
    h2 = jnp.dot(w2_ref[...], h1,
                 preferred_element_type=jnp.float32) + b2_ref[...]
    h2 = _leaky_relu(h2)

    # Output layer ([1, H2] @ [H2, TB]) on VPU/XLU: broadcast-multiply by the
    # W3 column and reduce over sublanes.              -> [1, TB] lane-dense
    out = jnp.sum(w3c_ref[...] * h2, axis=0, keepdims=True) + b3_ref[...]
    out_ref[...] = out.astype(out_ref.dtype)


def mi_discriminator_forward(r, y, params, *, block_b=8192, min_steps=8):
    """MIDiscriminator forward via a single batch-tiled Pallas kernel.

    r: [B, u_dim], y: [B, y_dim]  (float32 or bfloat16).
    params: W1 [16, u_dim+y_dim], b1 [16], W2 [8, 16], b2 [8], W3 [1, 8], b3 [1]
            (PyTorch nn.Linear convention: out_features x in_features).
    Returns: [B, 1] float32.
    """
    B, u_dim = r.shape
    B_y, y_dim = y.shape
    assert B_y == B, "r and y must share the batch dimension"
    H1 = params["W1"].shape[0]
    H2 = params["W2"].shape[0]

    # Batch tile: multiple of 128 (it is the lane dim of the output), sized to
    # give >= `min_steps` grid steps when B allows (megacore sharding on v7x +
    # real pipelining), capped at `block_b` so the lane-padded (TB, dim) VMEM
    # input buffers (2 inputs x 2 bufs x TB*128*4B ~= 16 MiB at TB=8192) stay
    # inside the 32 MiB scoped-VMEM default on every TPU generation.
    TB = _round_up(max(1, pl.cdiv(B, min_steps)), 128)
    TB = min(TB, max(128, _round_up(block_b, 128)))
    n_tiles = pl.cdiv(B, TB)
    B_pad = n_tiles * TB          # only the tiny output is padded; r/y are not

    act_dtype = r.dtype
    # Split W1 once (tiny) into the columns acting on r and on y; cast layer-1
    # weights to the activation dtype so bf16 inputs take the bf16 MXU path
    # (accumulation stays f32 via preferred_element_type).
    w1 = params["W1"]
    w1r = w1[:, :u_dim].astype(act_dtype)                   # [H1, u_dim]
    w1y = w1[:, u_dim:u_dim + y_dim].astype(act_dtype)      # [H1, y_dim]
    b1 = params["b1"].astype(jnp.float32).reshape(H1, 1)    # [H1, 1]
    w2 = params["W2"].astype(jnp.float32)                   # [H2, H1]
    b2 = params["b2"].astype(jnp.float32).reshape(H2, 1)    # [H2, 1]
    w3c = params["W3"].astype(jnp.float32).reshape(H2, 1)   # [H2, 1] column
    b3 = params["b3"].astype(jnp.float32).reshape(1, 1)     # [1, 1]

    const = lambda shape: pl.BlockSpec(shape, lambda i: (0, 0))

    out_row = pl.pallas_call(
        _mi_disc_kernel,
        out_shape=jax.ShapeDtypeStruct((1, B_pad), jnp.float32),
        grid=(n_tiles,),
        in_specs=[
            pl.BlockSpec((TB, u_dim), lambda i: (i, 0)),     # r: batch-tiled
            pl.BlockSpec((TB, y_dim), lambda i: (i, 0)),     # y: batch-tiled
            const(w1r.shape), const(w1y.shape), const(b1.shape),   # resident
            const(w2.shape), const(b2.shape),
            const(w3c.shape), const(b3.shape),
        ],
        out_specs=pl.BlockSpec((1, TB), lambda i: (0, i)),
        compiler_params=pltpu.CompilerParams(
            dimension_semantics=("parallel",)),
    )(r, y, w1r, w1y, b1, w2, b2, w3c, b3)

    # [1, B_pad] -> [B, 1]: contiguous slice + free reshape (no transpose).
    return out_row[0, :B].reshape(B, 1)


def init_params(key, u_dim, y_dim, width_vec=None):
    """Deterministic parameter init mirroring nn.Linear shapes/ranges."""
    if width_vec is None:
        width_vec = [u_dim + y_dim, 16, 8]
    dims = width_vec + [1]
    params = {}
    keys = jax.random.split(key, 2 * (len(dims) - 1))
    for i in range(len(dims) - 1):
        fan_in, fan_out = dims[i], dims[i + 1]
        bound = 1.0 / jnp.sqrt(fan_in)
        w = jax.random.uniform(keys[2 * i], (fan_out, fan_in),
                               minval=-bound, maxval=bound, dtype=jnp.float32)
        b = jax.random.uniform(keys[2 * i + 1], (fan_out,),
                               minval=-bound, maxval=bound, dtype=jnp.float32)
        params[f"W{i + 1}"] = w
        params[f"b{i + 1}"] = b
    return params


def _reference_forward(r, y, params):
    """Pure-JAX reference (concat + 3 linears + LeakyReLU(0.2))."""
    x = jnp.concatenate([r, y], axis=-1)
    h = x @ params["W1"].T + params["b1"]
    h = jnp.where(h >= 0, h, 0.2 * h)
    h = h @ params["W2"].T + params["b2"]
    h = jnp.where(h >= 0, h, 0.2 * h)
    return h @ params["W3"].T + params["b3"]


if __name__ == "__main__":
    key = jax.random.PRNGKey(0)
    k_r, k_y, k_p = jax.random.split(key, 3)

    # Small deterministic example consistent with the module.
    B, u_dim, y_dim = 8, 4, 4
    r = jax.random.normal(k_r, (B, u_dim), dtype=jnp.float32)
    y = jax.random.normal(k_y, (B, y_dim), dtype=jnp.float32)
    params = init_params(k_p, u_dim, y_dim)

    out = jax.block_until_ready(mi_discriminator_forward(r, y, params))
    ref = _reference_forward(r, y, params)
    assert out.shape == (B, 1)
    assert jnp.allclose(out, ref, atol=1e-5, rtol=1e-5), (out, ref)

    # Ragged multi-tile batch (B not a multiple of the tile) exercises the
    # unpadded-input / padded-output boundary handling and multi-step grid.
    B2 = 300
    r2 = jax.random.normal(k_r, (B2, u_dim), dtype=jnp.float32)
    y2 = jax.random.normal(k_y, (B2, y_dim), dtype=jnp.float32)
    out2 = jax.block_until_ready(
        mi_discriminator_forward(r2, y2, params, block_b=128))
    ref2 = _reference_forward(r2, y2, params)
    assert out2.shape == (B2, 1)
    assert jnp.allclose(out2, ref2, atol=1e-5, rtol=1e-5)

    print("KERNEL_OK")
</pallas_src>

<mosaic_0001>
module attributes {stable_mosaic.version = 11 : i64} {
  func.func @_mi_disc_kernel(%arg0: i32, %arg1: memref<128x4xf32, #tpu.memory_space<vmem>>, %arg2: memref<128x4xf32, #tpu.memory_space<vmem>>, %arg3: memref<16x4xf32, #tpu.memory_space<vmem>>, %arg4: memref<16x4xf32, #tpu.memory_space<vmem>>, %arg5: memref<16x1xf32, #tpu.memory_space<vmem>>, %arg6: memref<8x16xf32, #tpu.memory_space<vmem>>, %arg7: memref<8x1xf32, #tpu.memory_space<vmem>>, %arg8: memref<8x1xf32, #tpu.memory_space<vmem>>, %arg9: memref<1x1xf32, #tpu.memory_space<vmem>>, %arg10: memref<1x128xf32, #tpu.memory_space<vmem>>) attributes {dimension_semantics = [#tpu.dimension_semantics<parallel>], iteration_bounds = array<i64: 1>, scalar_prefetch = 0 : i64, scratch_operands = 0 : i64, tpu.core_type = #tpu.core_type<tc>, window_params = [{transform_indices = @transform_0, window_bounds = array<i64: 128, 4>}, {transform_indices = @transform_1, window_bounds = array<i64: 128, 4>}, {pipeline_mode = #tpu.pipeline_mode<synchronous>, transform_indices = @transform_2, window_bounds = array<i64: 16, 4>}, {pipeline_mode = #tpu.pipeline_mode<synchronous>, transform_indices = @transform_3, window_bounds = array<i64: 16, 4>}, {pipeline_mode = #tpu.pipeline_mode<synchronous>, transform_indices = @transform_4, window_bounds = array<i64: 16, 1>}, {pipeline_mode = #tpu.pipeline_mode<synchronous>, transform_indices = @transform_5, window_bounds = array<i64: 8, 16>}, {pipeline_mode = #tpu.pipeline_mode<synchronous>, transform_indices = @transform_6, window_bounds = array<i64: 8, 1>}, {pipeline_mode = #tpu.pipeline_mode<synchronous>, transform_indices = @transform_7, window_bounds = array<i64: 8, 1>}, {pipeline_mode = #tpu.pipeline_mode<synchronous>, transform_indices = @transform_8, window_bounds = array<i64: 1, 1>}, {transform_indices = @transform_9, window_bounds = array<i64: 1, 128>}]} {
    %c0 = arith.constant 0 : index
    %c0_0 = arith.constant 0 : index
    %0 = vector.load %arg3[%c0, %c0_0] : memref<16x4xf32, #tpu.memory_space<vmem>>, vector<16x4xf32>
    %c0_1 = arith.constant 0 : index
    %c0_2 = arith.constant 0 : index
    %1 = vector.load %arg1[%c0_1, %c0_2] : memref<128x4xf32, #tpu.memory_space<vmem>>, vector<128x4xf32>
    %cst = arith.constant dense<0.000000e+00> : vector<16x128xf32>
    %2 = tpu.matmul %0, %1, %cst {dimension_numbers = #tpu.dot_dimension_numbers<[1], [1], [0], [0], [0, 0, 1, 0], [], []>} : vector<16x4xf32>, vector<128x4xf32>, vector<16x128xf32> -> vector<16x128xf32>
    %c0_3 = arith.constant 0 : index
    %c0_4 = arith.constant 0 : index
    %3 = vector.load %arg4[%c0_3, %c0_4] : memref<16x4xf32, #tpu.memory_space<vmem>>, vector<16x4xf32>
    %c0_5 = arith.constant 0 : index
    %c0_6 = arith.constant 0 : index
    %4 = vector.load %arg2[%c0_5, %c0_6] : memref<128x4xf32, #tpu.memory_space<vmem>>, vector<128x4xf32>
    %cst_7 = arith.constant dense<0.000000e+00> : vector<16x128xf32>
    %5 = tpu.matmul %3, %4, %cst_7 {dimension_numbers = #tpu.dot_dimension_numbers<[1], [1], [0], [0], [0, 0, 1, 0], [], []>} : vector<16x4xf32>, vector<128x4xf32>, vector<16x128xf32> -> vector<16x128xf32>
    %6 = arith.addf %2, %5 : vector<16x128xf32>
    %c0_8 = arith.constant 0 : index
    %c0_9 = arith.constant 0 : index
    %7 = vector.load %arg5[%c0_8, %c0_9] : memref<16x1xf32, #tpu.memory_space<vmem>>, vector<16x1xf32>
    %8 = vector.broadcast %7 : vector<16x1xf32> to vector<16x128xf32>
    %9 = arith.addf %6, %8 : vector<16x128xf32>
    %cst_10 = arith.constant 0.000000e+00 : f32
    %10 = vector.broadcast %cst_10 : f32 to vector<16x128xf32>
    %11 = arith.cmpf oge, %9, %10 : vector<16x128xf32>
    %cst_11 = arith.constant 2.000000e-01 : f32
    %12 = vector.broadcast %cst_11 : f32 to vector<16x128xf32>
    %13 = arith.mulf %12, %9 : vector<16x128xf32>
    %14 = arith.select %11, %9, %13 : vector<16x128xi1>, vector<16x128xf32>
    %c0_12 = arith.constant 0 : index
    %c0_13 = arith.constant 0 : index
    %15 = vector.load %arg6[%c0_12, %c0_13] : memref<8x16xf32, #tpu.memory_space<vmem>>, vector<8x16xf32>
    %cst_14 = arith.constant dense<0.000000e+00> : vector<8x128xf32>
    %16 = tpu.matmul %15, %14, %cst_14 {dimension_numbers = #tpu.dot_dimension_numbers<[1], [0], [0], [1], [0, 0, 1, 1], [], []>} : vector<8x16xf32>, vector<16x128xf32>, vector<8x128xf32> -> vector<8x128xf32>
    %c0_15 = arith.constant 0 : index
    %c0_16 = arith.constant 0 : index
    %17 = vector.load %arg7[%c0_15, %c0_16] : memref<8x1xf32, #tpu.memory_space<vmem>>, vector<8x1xf32>
    %18 = vector.broadcast %17 : vector<8x1xf32> to vector<8x128xf32>
    %19 = arith.addf %16, %18 : vector<8x128xf32>
    %cst_17 = arith.constant 0.000000e+00 : f32
    %20 = vector.broadcast %cst_17 : f32 to vector<8x128xf32>
    %21 = arith.cmpf oge, %19, %20 : vector<8x128xf32>
    %cst_18 = arith.constant 2.000000e-01 : f32
    %22 = vector.broadcast %cst_18 : f32 to vector<8x128xf32>
    %23 = arith.mulf %22, %19 : vector<8x128xf32>
    %24 = arith.select %21, %19, %23 : vector<8x128xi1>, vector<8x128xf32>
    %c0_19 = arith.constant 0 : index
    %c0_20 = arith.constant 0 : index
    %25 = vector.load %arg8[%c0_19, %c0_20] : memref<8x1xf32, #tpu.memory_space<vmem>>, vector<8x1xf32>
    %26 = vector.broadcast %25 : vector<8x1xf32> to vector<8x128xf32>
    %27 = arith.mulf %26, %24 : vector<8x128xf32>
    %cst_21 = arith.constant dense<0.000000e+00> : vector<128xf32>
    %28 = vector.multi_reduction <add>, %27, %cst_21 [0] : vector<8x128xf32> to vector<128xf32>
    %29 = vector.shape_cast %28 : vector<128xf32> to vector<1x128xf32>
    %c0_22 = arith.constant 0 : index
    %c0_23 = arith.constant 0 : index
    %30 = vector.load %arg9[%c0_22, %c0_23] : memref<1x1xf32, #tpu.memory_space<vmem>>, vector<1x1xf32>
    %31 = vector.broadcast %30 : vector<1x1xf32> to vector<1x128xf32>
    %32 = arith.addf %29, %31 : vector<1x128xf32>
    %c0_24 = arith.constant 0 : index
    %c0_25 = arith.constant 0 : index
    %33 = vector.load %arg10[%c0_24, %c0_25] : memref<1x128xf32, #tpu.memory_space<vmem>>, vector<1x128xf32>
    tpu.vector_store %arg10[%c0_24, %c0_25], %32 {strides = array<i32>} : memref<1x128xf32, #tpu.memory_space<vmem>>, vector<1x128xf32>,
    return
  }
  func.func @transform_0(%arg0: i32) -> (i32, i32) {
    %c0_i32 = arith.constant 0 : i32
    %c0_i32_0 = arith.constant 0 : i32
    return %arg0, %c0_i32 : i32, i32
  }
  func.func @transform_1(%arg0: i32) -> (i32, i32) {
    %c0_i32 = arith.constant 0 : i32
    %c0_i32_0 = arith.constant 0 : i32
    return %arg0, %c0_i32 : i32, i32
  }
  func.func @transform_2(%arg0: i32) -> (i32, i32) {
    %c0_i32 = arith.constant 0 : i32
    %c0_i32_0 = arith.constant 0 : i32
    %c0_i32_1 = arith.constant 0 : i32
    return %c0_i32, %c0_i32_0 : i32, i32
  }
  func.func @transform_3(%arg0: i32) -> (i32, i32) {
    %c0_i32 = arith.constant 0 : i32
    %c0_i32_0 = arith.constant 0 : i32
    %c0_i32_1 = arith.constant 0 : i32
    return %c0_i32, %c0_i32_0 : i32, i32
  }
  func.func @transform_4(%arg0: i32) -> (i32, i32) {
    %c0_i32 = arith.constant 0 : i32
    %c0_i32_0 = arith.constant 0 : i32
    %c0_i32_1 = arith.constant 0 : i32
    return %c0_i32, %c0_i32_0 : i32, i32
  }
  func.func @transform_5(%arg0: i32) -> (i32, i32) {
    %c0_i32 = arith.constant 0 : i32
    %c0_i32_0 = arith.constant 0 : i32
    %c0_i32_1 = arith.constant 0 : i32
    return %c0_i32, %c0_i32_0 : i32, i32
  }
  func.func @transform_6(%arg0: i32) -> (i32, i32) {
    %c0_i32 = arith.constant 0 : i32
    %c0_i32_0 = arith.constant 0 : i32
    %c0_i32_1 = arith.constant 0 : i32
    return %c0_i32, %c0_i32_0 : i32, i32
  }
  func.func @transform_7(%arg0: i32) -> (i32, i32) {
    %c0_i32 = arith.constant 0 : i32
    %c0_i32_0 = arith.constant 0 : i32
    %c0_i32_1 = arith.constant 0 : i32
    return %c0_i32, %c0_i32_0 : i32, i32
  }
  func.func @transform_8(%arg0: i32) -> (i32, i32) {
    %c0_i32 = arith.constant 0 : i32
    %c0_i32_0 = arith.constant 0 : i32
    %c0_i32_1 = arith.constant 0 : i32
    return %c0_i32, %c0_i32_0 : i32, i32
  }
  func.func @transform_9(%arg0: i32) -> (i32, i32) {
    %c0_i32 = arith.constant 0 : i32
    %c0_i32_0 = arith.constant 0 : i32
    return %c0_i32, %arg0 : i32, i32
  }
}

</mosaic_0001>

<bundles_post_ra>
// kernel: tpu_custom_call.1
= control target key start
LH: loop header
LB: loop body
LE: loop exit
PB: predicated region body
PF: predicated region fallthrough
CT: control target
= control target key end

     0   :  { %s1025_s0 = inlined_call_operand.vmem [shape: f32[8,4], index: 0, kind: input, shape index: {}]   ;;  %s1026_s1 = inlined_call_operand.vmem [shape: f32[8,4], index: 1, kind: input, shape index: {}]   ;;  %s1027_s2 = inlined_call_operand.vmem [shape: f32[16,4], index: 2, kind: input, shape index: {}]   ;;  %s1028_s3 = inlined_call_operand.vmem [shape: f32[16,4], index: 3, kind: input, shape index: {}]   ;;  %s1029_s4 = inlined_call_operand.vmem [shape: f32[16,1], index: 4, kind: input, shape index: {}]   ;;  %s1030_s5 = inlined_call_operand.vmem [shape: f32[8,16], index: 5, kind: input, shape index: {}]   ;;  %s1031_s6 = inlined_call_operand.vmem [shape: f32[8,1], index: 6, kind: input, shape index: {}]   ;;  %s1032_s7 = inlined_call_operand.vmem [shape: f32[8,1], index: 7, kind: input, shape index: {}]   ;;  %s1033_s8 = inlined_call_operand.<no memory space> [shape: f32[1,1], index: 8, kind: input, shape index: {}]   ;;  %s1034_s9 = inlined_call_operand.hbm [shape: f32[1,128], index: 9, kind: output, shape index: {}]  }
   0x1   :  { %v14_v0 = vstv %s1033_s8 }
   0x2   :  { %15 = vst [vmem:[#allocation2] sm:$0x1] %v14_v0 }
   0x3   :  { %v55_v1 = vld [vmem:[%s1026_s1] sm:$0xff]  ;;  %v56_v2 = vld [vmem:[%s1026_s1 + $0x8] sm:$0xff]  ;;  %vm71_vm0 = vcmask 31744   ;;  %v57_v7 = vld [vmem:[%s1026_s1 + $0x10] sm:$0xff]  ;;  %v758_v8 = vmov 0  }
   0x4   :  { %v37_v3 = vld [vmem:[%s1025_s0] sm:$0xff]  ;;  %v626_v4 = vpack.c.bf16 %v56_v2, %v55_v1  ;;  %vm827_vm1 = vmpackc.low %vm71_vm0, %vm71_vm0  ;;  %v38_v6 = vld [vmem:[%s1025_s0 + $0x8] sm:$0xff]  ;;  %732 = vset.pattern.permute.xlu0 %v758_v8  ;;  %733 = vset.pattern.permute.xlu1 %v758_v8 }
   0x5   :  { %v674_v9 = vpack.c.bf16 %v38_v6, %v37_v3  ;;  %v58_v10 = vld [vmem:[%s1026_s1 + $0x18] sm:$0xff]  ;;  %v39_v11 = vld [vmem:[%s1025_s0 + $0x10] sm:$0xff]  ;;  %v59_v15 = vld [vmem:[%s1026_s1 + $0x20] sm:$0xff] }
   0x6   :  { %v40_v12 = vld [vmem:[%s1025_s0 + $0x18] sm:$0xff]  ;;  %628 = vmatprep.subr.msk.bf16.mxu1 %vm827_vm1, %v626_v4  ;;  %v632_v13 = vpack.c.bf16 %v58_v10, %v57_v7  ;;  %v60_v16 = vld [vmem:[%s1026_s1 + $0x28] sm:$0xff]  ;;  %v41_v17 = vld [vmem:[%s1025_s0 + $0x20] sm:$0xff] }
   0x7   :  { %v680_v14 = vpack.c.bf16 %v40_v12, %v39_v11  ;;  %676 = vmatprep.subr.msk.bf16.mxu0 %vm827_vm1, %v674_v9  ;;  %631 = vmatpush3.bf16.xpose.msk.msra.mxu1 %vm827_vm1, %v626_v4  ;;  %v42_v18 = vld [vmem:[%s1025_s0 + $0x28] sm:$0xff]  ;;  %v638_v19 = vpack.c.bf16 %v60_v16, %v59_v15  ;;  %v53_v21 = vld [vmem:[%s1028_s3] sm:$0xff] }
   0x8   :  { %679 = vmatpush3.bf16.xpose.msk.msra.mxu0 %vm827_vm1, %v674_v9  ;;  %634 = vmatprep.subr.msk.bf16.mxu1 %vm827_vm1, %v632_v13  ;;  %v686_v20 = vpack.c.bf16 %v42_v18, %v41_v17  ;;  %v35_v22 = vld [vmem:[%s1027_s2] sm:$0xff] }
   0x9   :  { %682 = vmatprep.subr.msk.bf16.mxu0 %vm827_vm1, %v680_v14  ;;  %581 = vmatprep.mubr.msk.f32.mxu1 %vm71_vm0, %v53_v21  ;;  %v330_v23 = vld [vmem:[%s1029_s4] sm:$0xff] }
   0xf   :  { %637 = vmatpush3.bf16.xpose.msk.msra.mxu1 %vm827_vm1, %v632_v13 }
  0x10   :  { %685 = vmatpush3.bf16.xpose.msk.msra.mxu0 %vm827_vm1, %v680_v14  ;;  %640 = vmatprep.subr.msk.bf16.mxu1 %vm827_vm1, %v638_v19 }
  0x11   :  { %16 = vsyncpa [#allocation4], 0  ;;  %688 = vmatprep.subr.msk.bf16.mxu0 %vm827_vm1, %v686_v20  ;;  %v61_v24 = vld [vmem:[%s1026_s1 + $0x30] sm:$0xff]  ;;  %v62_v25 = vld [vmem:[%s1026_s1 + $0x38] sm:$0xff]  ;;  %616 = vmatprep.mubr.msk.f32.mxu0 %vm71_vm0, %v35_v22  ;;  %v759_v58 = vmov 0.0|0.0   ;;  %vm760_vm2 = vmmov 0   ;;  %v453_v21 = vlaneseq }
  0x12   :  { %v43_v26 = vld [vmem:[%s1025_s0 + $0x30] sm:$0xff]  ;;  %v44_v27 = vld [vmem:[%s1025_s0 + $0x38] sm:$0xff]  ;;  %334 = vperm.xlu0 %732, %v330_v23   ;;  %v331_v28 = vld [vmem:[%s1029_s4 + $0x8] sm:$0xff]  ;;  %v644_v29 = vpack.c.bf16 %v62_v25, %v61_v24  ;;  %v761_v59 = vmov 0.0   ;;  %vm357_vm5 = vcmask 130048  }
  0x13   :  { %v692_v30 = vpack.c.bf16 %v44_v27, %v43_v26  ;;  %v447_v31 = vld [vmem:[#allocation2] sm:$0x1]  ;;  %v64_v33 = vld [vmem:[%s1026_s1 + $0x48] sm:$0xff]  ;;  %v65_v38 = vld [vmem:[%s1026_s1 + $0x50] sm:$0xff]  ;;  %v454_v24 = vshrl.u32 %v453_v21, 7 }
  0x14   :  { %v63_v32 = vld [vmem:[%s1026_s1 + $0x40] sm:$0xff]  ;;  %v46_v35 = vld [vmem:[%s1025_s0 + $0x48] sm:$0xff]  ;;  %v66_v39 = vld [vmem:[%s1026_s1 + $0x58] sm:$0xff] }
  0x15   :  { %v45_v34 = vld [vmem:[%s1025_s0 + $0x40] sm:$0xff]  ;;  %v650_v36 = vpack.c.bf16 %v64_v33, %v63_v32  ;;  %v47_v40 = vld [vmem:[%s1025_s0 + $0x50] sm:$0xff]  ;;  %v48_v41 = vld [vmem:[%s1025_s0 + $0x58] sm:$0xff]  ;;  %v656_v42 = vpack.c.bf16 %v66_v39, %v65_v38  ;;  %v455_v27 = vsub.s32 0, %v454_v24 }
  0x16   :  { %339 = vperm.xlu0 %732, %v331_v28   ;;  %v698_v37 = vpack.c.bf16 %v46_v35, %v45_v34  ;;  %v704_v43 = vpack.c.bf16 %v48_v41, %v47_v40  ;;  %v67_v44 = vld [vmem:[%s1026_s1 + $0x60] sm:$0xff]  ;;  %v68_v45 = vld [vmem:[%s1026_s1 + $0x68] sm:$0xff]  ;;  %v69_v50 = vld [vmem:[%s1026_s1 + $0x70] sm:$0xff] }
  0x17   :  { %643 = vmatpush3.bf16.xpose.msk.msra.mxu1 %vm827_vm1, %v638_v19  ;;  %v49_v46 = vld [vmem:[%s1025_s0 + $0x60] sm:$0xff]  ;;  %v50_v47 = vld [vmem:[%s1025_s0 + $0x68] sm:$0xff]  ;;  %v662_v48 = vpack.c.bf16 %v68_v45, %v67_v44  ;;  %v70_v51 = vld [vmem:[%s1026_s1 + $0x78] sm:$0xff] }
  0x18   :  { %691 = vmatpush3.bf16.xpose.msk.msra.mxu0 %vm827_vm1, %v686_v20  ;;  %646 = vmatprep.subr.msk.bf16.mxu1 %vm827_vm1, %v644_v29  ;;  %v710_v49 = vpack.c.bf16 %v50_v47, %v49_v46  ;;  %v51_v52 = vld [vmem:[%s1025_s0 + $0x70] sm:$0xff]  ;;  %v52_v53 = vld [vmem:[%s1025_s0 + $0x78] sm:$0xff]  ;;  %v668_v54 = vpack.c.bf16 %v70_v51, %v69_v50  ;;  %v54_v56 = vld [vmem:[%s1028_s3 + $0x8] sm:$0xff] }
  0x19   :  { %694 = vmatprep.subr.msk.bf16.mxu0 %vm827_vm1, %v692_v30  ;;  %v716_v55 = vpack.c.bf16 %v52_v53, %v51_v52  ;;  %v36_v57 = vld [vmem:[%s1027_s2 + $0x8] sm:$0xff]  ;;  %v351_v60 = vld [vmem:[%s1031_s6] sm:$0xff] }
  0x1a   :  { %450 = vperm.xlu0 %732, %v447_v31   ;;  %354 = vperm.xlu1 %733, %v351_v60   ;;  %v434_v61 = vld [vmem:[%s1032_s7] sm:$0xff] }
  0x1b   :  { %v350_v13 = vld [vmem:[%s1030_s5] sm:$0xff]  ;;  %s762_s5 = smov [#allocation3]  }
  0x1c   :  { %s465_s7 = sshll.u32 %s762_s5, 4  ;;  %s466_s7 = int_to_ptr.vmem [resolvable:$true] %s465_s7 }
  0x1d   :  { %s734_s19 = scalar_lea.vmem %s466_s7, 16  ;;  %s738_s20 = scalar_lea.vmem %s466_s7, 32 }
  0x1e   :  { %437 = vperm.xlu1 %733, %v434_v61   ;;  %p735_p0 = scmp.ne.s32.totalorder %s466_s7, %s734_s19  ;;  %p739_p1 = scmp.lt.s32.totalorder %s466_s7, %s466_s7 }
  0x1f   :  { %649 = vmatpush3.bf16.xpose.msk.msra.mxu1 %vm827_vm1, %v644_v29  ;;  %p740_p2 = scmp.lt.s32.totalorder %s738_s20, %s734_s19 }
  0x20   :  { %697 = vmatpush3.bf16.xpose.msk.msra.mxu0 %vm827_vm1, %v692_v30  ;;  %652 = vmatprep.subr.msk.bf16.mxu1 %vm827_vm1, %v650_v36 }
  0x21   :  { %700 = vmatprep.subr.msk.bf16.mxu0 %vm827_vm1, %v698_v37  ;;  %p741_p3 = por %p740_p2, %p739_p1 }
  0x23   :  { %p742_p4 = pnand %p741_p3, %p735_p0 }
  0x27   :  { %655 = vmatpush3.bf16.xpose.msk.msra.mxu1 %vm827_vm1, %v650_v36 }
  0x28   :  { %703 = vmatpush3.bf16.xpose.msk.msra.mxu0 %vm827_vm1, %v698_v37  ;;  %658 = vmatprep.subr.msk.bf16.mxu1 %vm827_vm1, %v656_v42 }
  0x29   :  { %706 = vmatprep.subr.msk.bf16.mxu0 %vm827_vm1, %v704_v43 }
  0x2f   :  { %661 = vmatpush3.bf16.xpose.msk.msra.mxu1 %vm827_vm1, %v656_v42 }
  0x30   :  { %709 = vmatpush3.bf16.xpose.msk.msra.mxu0 %vm827_vm1, %v704_v43  ;;  %664 = vmatprep.subr.msk.bf16.mxu1 %vm827_vm1, %v662_v48 }
  0x31   :  { %712 = vmatprep.subr.msk.bf16.mxu0 %vm827_vm1, %v710_v49 }
  0x37   :  { %667 = vmatpush3.bf16.xpose.msk.msra.mxu1 %vm827_vm1, %v662_v48 }
  0x38   :  { %715 = vmatpush3.bf16.xpose.msk.msra.mxu0 %vm827_vm1, %v710_v49  ;;  %670 = vmatprep.subr.msk.bf16.mxu1 %vm827_vm1, %v668_v54 }
  0x39   :  { %718 = vmatprep.subr.msk.bf16.mxu0 %vm827_vm1, %v716_v55 }
  0x3f   :  { %673 = vmatpush3.bf16.xpose.msk.msra.mxu1 %vm827_vm1, %v668_v54 }
  0x40   :  { %721 = vmatpush3.bf16.xpose.msk.msra.mxu0 %vm827_vm1, %v716_v55  ;;  %722 = vmatprep.subr.bf16.mxu1 %v759_v58 }
  0x46   :  { %582 = vmatmul.mubr.msk.f32.vlgmr.msra.gmra.mrb[0].mxu1 %vm71_vm0, %v54_v56 }
  0x47   :  { %617 = vmatmul.mubr.msk.f32.vlgmr.msra.gmra.mrb[0].mxu0 %vm71_vm0, %v36_v57  ;;  %623 = vmatprep.mubr.msk.f32.mxu1 %vm760_vm2, %v761_v59 }
  0x91   :  { %v335_v62 = vpop.permute.xlu0 %334 }
  0x95   :  { %v340_v4 = vpop.permute.xlu0 %339 }
  0x99   :  { %v355_v14 = vpop.permute.xlu1 %354  ;;  %v451_v29 = vpop.permute.xlu0 %450 }
  0x9a   :  { %v456_v31 = vrot.slane %v451_v29, %v455_v27 }
  0x9d   :  { %v438_v19 = vpop.permute.xlu1 %437 }
 0x119   :  { %v583_v63 = vpop.f32.mrb[0].mxu1 }
 0x11a   :  { %v618_v0 = vpop.f32.mrb[0].mxu0  ;;  %v192_v1 = vpop.f32.mrb[1].mxu1 }
 0x11b   :  { %v327_v2 = vadd.f32 %v618_v0, %v583_v63  ;;  %v321_v3 = vpop.f32.mrb[1].mxu0 }
 0x11c   :  { %v322_v5 = vadd.f32 %v321_v3, %v192_v1 }
 0x11d   :  { %v343_v6 = vadd.f32 %v340_v4, %v327_v2 }
 0x11e   :  { %v342_v7 = vadd.f32 %v335_v62, %v322_v5 }
 0x11f   :  { %vm345_vm3 = vcmp.ge.f32.partialorder %v343_v6, 0.0  ;;  %v347_v8 = vmul.f32 0.2, %v343_v6 }
 0x120   :  { %vm344_vm4 = vcmp.ge.f32.partialorder %v342_v7, 0.0  ;;  %v346_v9 = vmul.f32 0.2, %v342_v7 }
 0x121   :  { %v349_v10 = vsel %vm345_vm3, %v343_v6, %v347_v8 }
 0x122   :  { %v348_v11 = vsel %vm344_vm4, %v342_v7, %v346_v9 }
 0x123   :  { %v723_v12 = vpack.c.bf16 %v349_v10, %v348_v11 }
 0x125   :  { %724 = vmatpush3.bf16.msra.mxu1 %v723_v12 }
 0x128   :  { %624 = vmatmul.mubr.msk.f32.vlgmr.msra.gmra.mrb[2].mxu1 %vm357_vm5, %v350_v13 }
 0x1fb   :  { %v427_v15 = vpop.f32.mrb[2].mxu1 }
 0x1fc   :  { %v428_v16 = vadd.f32 %v427_v15, %v355_v14  ;;  %v625_v17 = vpop.f32.mrb[3].mxu1 }
 0x1fe   :  { %v432_v18 = vmul.f32 0.2, %v428_v16  ;;  %vm431_vm6 = vcmp.ge.f32.partialorder %v428_v16, 0.0 }
 0x200   :  { %v433_v20 = vsel %vm431_vm6, %v428_v16, %v432_v18 }
 0x201   :  { %v440_v22 = vmul.f32 %v438_v19, %v433_v20 }
 0x203   :  { %v441_v23 = vrot.slane %v440_v22, 4 }
 0x205   :  { %v442_v25 = vadd.f32 %v441_v23, %v440_v22 }
 0x207   :  { %v443_v26 = vrot.slane %v442_v25, 2 }
 0x209   :  { %v444_v28 = vadd.f32 %v443_v26, %v442_v25 }
 0x20b   :  { %v445_v30 = vrot.slane %v444_v28, 1 }
 0x20d   :  { %v446_v32 = vadd.f32 %v445_v30, %v444_v28 }
 0x20f   :  { %v457_v33 = vadd.f32 %v456_v31, %v446_v32 }
 0x211   :  { %458 = vst [vmem:[#allocation3] sm:$0x1] %v457_v33 }
 0x212   :  { %745 = shalt.err (!%p742_p4)
}
 0x213   :  { %s746_s23 = scalar_lea.hbm %s1034_s9, 16 }
 0x214   :  { %p747_p5 = scmp.ne.s32.totalorder %s1034_s9, %s746_s23  ;;  %p750_p6 = scmp.lt.u32.totalorder %s746_s23, %s1034_s9 }
 0x216   :  { %p752_p7 = pnand %p750_p6, %p747_p5 }
 0x218   :  { %755 = shalt.err (!%p752_p7)
}
 0x219   :  { %468 = dma.vmem_to_hbm [thread:$0]  %s466_s7, 16, %s1034_s9, [#allocation4]  }
 0x21a   :  { %756 = dma.done.wait [#allocation4], 16  }
 0x21b   :  { %757 = vsyncadd [#allocation4], 4294967280 }
 0x21c   :  { %472 = vsyncpa [#allocation4], 1 }

</bundles_post_ra>
